<compile_context>
chip_gen: v6e
topology: v6e:2x2x1
jax: 0.10.0
libtpu: 0.0.40
codegen_flags: <defaults>
</compile_context>

<pallas_src>
import jax
import jax.numpy as jnp
from jax import lax
from jax.experimental import pallas as pl
from jax.experimental.pallas import tpu as pltpu


COUT_PAD = 128   # lane-dense output-channel padding for the conv kernels
NC_PAD = 128     # lane-dense logit padding for the FC kernel


def _round_up(x, m):
    return ((x + m - 1) // m) * m


# ----------------------------- Pallas kernels --------------------------------

def _conv_bn_relu_pool_kernel(p_ref, w_ref, shift_ref, o_ref):
    # p_ref:     (BT, 4*Ppad, KKCp) im2col patches, rows grouped (quadrant, pooled h, pooled w)
    # w_ref:     (KKCp, 128)        conv weights with BN scale folded in, zero-padded cols/rows
    # shift_ref: (1, 128)           folded BN shift (+ conv bias), zero-padded
    # o_ref:     (BT, Ppad, 128)    pooled output, rows in pooled (h, w) row-major order
    bt = o_ref.shape[0]
    ppad = o_ref.shape[1]
    for b in range(bt):                                        # static, small batch tile
        y = jnp.dot(p_ref[b], w_ref[...],
                    preferred_element_type=jnp.float32)        # conv as one MXU matmul
        m = jnp.maximum(jnp.maximum(y[0 * ppad:1 * ppad], y[1 * ppad:2 * ppad]),
                        jnp.maximum(y[2 * ppad:3 * ppad], y[3 * ppad:4 * ppad]))  # MaxPool2d(2)
        o_ref[b] = jnp.maximum(m + shift_ref[...], 0.0)        # BN shift + ReLU (commute w/ max)


def _fc_logsoftmax_kernel(x_ref, w_ref, b_ref, o_ref):
    # x_ref: (1, D), w_ref: (D, 128), b_ref: (1, 128) with -1e30 in padded cols, o_ref: (1, 128)
    logits = jnp.dot(x_ref[...], w_ref[...], preferred_element_type=jnp.float32) + b_ref[...]
    m = jnp.max(logits, axis=-1, keepdims=True)
    lse = m + jnp.log(jnp.sum(jnp.exp(logits - m), axis=-1, keepdims=True))
    o_ref[...] = logits - lse                                  # log_softmax (padded cols vanish)


# ------------------------------ JAX glue --------------------------------------

def _im2col_pool_grouped(x_nhwc, K, pad, ppad, kkcp):
    """im2col with rows grouped as (pool quadrant, pooled h, pooled w).  The pooled-position
    axis is zero-padded to `ppad` (multiple of 8) and the tap axis to `kkcp`.  Pure data
    movement (glue)."""
    B, H, W, C = x_nhwc.shape
    Ho, Wo = H // 2, W // 2
    P = Ho * Wo
    KKC = K * K * C
    xp = jnp.pad(x_nhwc, ((0, 0), (pad, pad), (pad, pad), (0, 0)))
    taps = [xp[:, kh:kh + H, kw:kw + W, :] for kh in range(K) for kw in range(K)]
    patches = jnp.stack(taps, axis=3).reshape(B, H, W, KKC)
    patches = patches.reshape(B, Ho, 2, Wo, 2, KKC).transpose(0, 2, 4, 1, 3, 5)
    patches = patches.reshape(B, 4, P, KKC)
    patches = jnp.pad(patches, ((0, 0), (0, 0), (0, ppad - P), (0, kkcp - KKC)))
    return patches.reshape(B, 4 * ppad, kkcp)


def conv_bn_relu_pool(x_nhwc, w2d, scale, shift, K=5, pad=2, bt=1):
    B, H, W, C = x_nhwc.shape
    KKC, Cout = w2d.shape
    Ho, Wo = H // 2, W // 2
    P = Ho * Wo
    ppad = _round_up(P, 8)       # sublane-aligned quadrant blocks
    kkcp = _round_up(KKC, 8)     # pad layer1's 25-wide contraction to 32
    assert B % bt == 0

    patches = _im2col_pool_grouped(x_nhwc, K, pad, ppad, kkcp)       # (B, 4*ppad, kkcp)

    # Fold BN scale into the weights; pad to lane-dense shapes with exact zeros so the
    # padded channels stay zero through ReLU/pool/flatten.
    w_scaled = w2d * scale[None, :]
    w_pad = jnp.zeros((kkcp, COUT_PAD), jnp.float32).at[:KKC, :Cout].set(w_scaled)
    shift_pad = jnp.zeros((1, COUT_PAD), jnp.float32).at[0, :Cout].set(shift)

    out = pl.pallas_call(
        _conv_bn_relu_pool_kernel,
        out_shape=jax.ShapeDtypeStruct((B, ppad, COUT_PAD), jnp.float32),
        grid_spec=pltpu.PrefetchScalarGridSpec(
            num_scalar_prefetch=0,
            grid=(B // bt,),
            in_specs=[
                pl.BlockSpec((bt, 4 * ppad, kkcp), lambda i: (i, 0, 0)),
                pl.BlockSpec((kkcp, COUT_PAD), lambda i: (0, 0)),
                pl.BlockSpec((1, COUT_PAD), lambda i: (0, 0)),
            ],
            out_specs=pl.BlockSpec((bt, ppad, COUT_PAD), lambda i: (i, 0, 0)),
        ),
        compiler_params=pltpu.CompilerParams(
            dimension_semantics=("parallel",),
            vmem_limit_bytes=32 * 1024 * 1024),
    )(patches, w_pad, shift_pad)

    # rows :P are pooled (h, w) row-major; channels :Cout are real, the rest are padding.
    return out[:, :P, :Cout].reshape(B, Ho, Wo, Cout)


def fc_log_softmax(x_flat, w, b):
    B, D = x_flat.shape
    Nc = w.shape[1]
    # Lane-dense logits: zero weight columns and a very negative bias for padded classes so
    # they contribute exactly zero to the softmax normalizer.
    w_pad = jnp.zeros((D, NC_PAD), jnp.float32).at[:, :Nc].set(w)
    b_pad = jnp.full((1, NC_PAD), -1e30, jnp.float32).at[0, :Nc].set(b)
    x3 = x_flat.reshape(B, 1, D)

    out = pl.pallas_call(
        _fc_logsoftmax_kernel,
        out_shape=jax.ShapeDtypeStruct((B, 1, NC_PAD), jnp.float32),
        grid_spec=pltpu.PrefetchScalarGridSpec(
            num_scalar_prefetch=0,
            grid=(B,),
            in_specs=[
                pl.BlockSpec((None, 1, D), lambda i: (i, 0, 0)),
                pl.BlockSpec((D, NC_PAD), lambda i: (0, 0)),
                pl.BlockSpec((1, NC_PAD), lambda i: (0, 0)),
            ],
            out_specs=pl.BlockSpec((None, 1, NC_PAD), lambda i: (i, 0, 0)),
        ),
        compiler_params=pltpu.CompilerParams(
            dimension_semantics=("parallel",),
            vmem_limit_bytes=32 * 1024 * 1024),
    )(x3, w_pad, b_pad)

    return out.reshape(B, NC_PAD)[:, :Nc]


def cnn_forward(x_nchw, params, bt=1):
    x = jnp.transpose(x_nchw, (0, 2, 3, 1))                                       # NCHW -> NHWC
    h = conv_bn_relu_pool(x, params["w1"], params["scale1"], params["shift1"], bt=bt)  # (B,14,14,16)
    h = conv_bn_relu_pool(h, params["w2"], params["scale2"], params["shift2"], bt=bt)  # (B,7,7,32)
    flat = h.reshape(h.shape[0], -1)                                              # (B, 7*7*32)
    return fc_log_softmax(flat, params["wfc"], params["bfc"])                     # (B, 2)


# --------------------------- pure-JAX reference --------------------------------

def reference_forward(x_nchw, params):
    x = jnp.transpose(x_nchw, (0, 2, 3, 1))

    def layer(h, w2d, scale, shift, K=5):
        Cin = h.shape[-1]
        Cout = w2d.shape[1]
        w4 = w2d.reshape(K, K, Cin, Cout)
        y = lax.conv_general_dilated(h, w4, (1, 1), "SAME",
                                     dimension_numbers=("NHWC", "HWIO", "NHWC"))
        y = jnp.maximum(y * scale + shift, 0.0)
        return lax.reduce_window(y, -jnp.inf, lax.max, (1, 2, 2, 1), (1, 2, 2, 1), "VALID")

    h = layer(x, params["w1"], params["scale1"], params["shift1"])
    h = layer(h, params["w2"], params["scale2"], params["shift2"])
    flat = h.reshape(h.shape[0], -1)
    logits = flat @ params["wfc"] + params["bfc"]
    return jax.nn.log_softmax(logits, axis=1)


# ----------------------------------- main --------------------------------------

if __name__ == "__main__":
    key = jax.random.PRNGKey(0)
    ks = jax.random.split(key, 12)
    eps = 1e-5

    # layer1: Conv2d(1, 16, 5, padding=2) + BatchNorm2d(16)
    w1 = 0.10 * jax.random.normal(ks[0], (5 * 5 * 1, 16), jnp.float32)
    cb1 = 0.10 * jax.random.normal(ks[1], (16,), jnp.float32)
    g1 = 1.0 + 0.10 * jax.random.normal(ks[2], (16,), jnp.float32)
    be1 = 0.10 * jax.random.normal(ks[3], (16,), jnp.float32)
    rm1, rv1 = jnp.zeros((16,), jnp.float32), jnp.ones((16,), jnp.float32)
    scale1 = g1 / jnp.sqrt(rv1 + eps)
    shift1 = be1 + (cb1 - rm1) * scale1

    # layer2: Conv2d(16, 32, 5, padding=2) + BatchNorm2d(32)
    w2 = 0.05 * jax.random.normal(ks[4], (5 * 5 * 16, 32), jnp.float32)
    cb2 = 0.10 * jax.random.normal(ks[5], (32,), jnp.float32)
    g2 = 1.0 + 0.10 * jax.random.normal(ks[6], (32,), jnp.float32)
    be2 = 0.10 * jax.random.normal(ks[7], (32,), jnp.float32)
    rm2, rv2 = jnp.zeros((32,), jnp.float32), jnp.ones((32,), jnp.float32)
    scale2 = g2 / jnp.sqrt(rv2 + eps)
    shift2 = be2 + (cb2 - rm2) * scale2

    # fc: Linear(7*7*32, 2)
    wfc = 0.05 * jax.random.normal(ks[8], (7 * 7 * 32, 2), jnp.float32)
    bfc = 0.10 * jax.random.normal(ks[9], (2,), jnp.float32)

    params = dict(w1=w1, scale1=scale1, shift1=shift1,
                  w2=w2, scale2=scale2, shift2=shift2,
                  wfc=wfc, bfc=bfc)

    x = jax.random.normal(ks[10], (2, 1, 28, 28), jnp.float32)  # NCHW, like PyTorch

    out = jax.block_until_ready(cnn_forward(x, params))
    ref = jax.block_until_ready(reference_forward(x, params))

    assert out.shape == (2, 2), out.shape
    assert jnp.allclose(out, ref, atol=1e-4, rtol=1e-4), (out, ref)
    print("KERNEL_OK")
</pallas_src>

<mosaic_0001>
module attributes {stable_mosaic.version = 11 : i64} {
  func.func @_conv_bn_relu_pool_kernel(%arg0: i32, %arg1: memref<1x800x32xf32, #tpu.memory_space<vmem>>, %arg2: memref<32x128xf32, #tpu.memory_space<vmem>>, %arg3: memref<1x128xf32, #tpu.memory_space<vmem>>, %arg4: memref<1x200x128xf32, #tpu.memory_space<vmem>>) attributes {dimension_semantics = [#tpu.dimension_semantics<parallel>], iteration_bounds = array<i64: 2>, scalar_prefetch = 0 : i64, scratch_operands = 0 : i64, tpu.core_type = #tpu.core_type<tc>, window_params = [{transform_indices = @transform_0, window_bounds = array<i64: 1, 800, 32>}, {pipeline_mode = #tpu.pipeline_mode<synchronous>, transform_indices = @transform_1, window_bounds = array<i64: 32, 128>}, {pipeline_mode = #tpu.pipeline_mode<synchronous>, transform_indices = @transform_2, window_bounds = array<i64: 1, 128>}, {transform_indices = @transform_3, window_bounds = array<i64: 1, 200, 128>}]} {
    %c0 = arith.constant 0 : index
    %c0_0 = arith.constant 0 : index
    %c0_1 = arith.constant 0 : index
    %0 = vector.load %arg1[%c0, %c0_0, %c0_1] : memref<1x800x32xf32, #tpu.memory_space<vmem>>, vector<1x800x32xf32>
    %1 = vector.shape_cast %0 : vector<1x800x32xf32> to vector<800x32xf32>
    %c0_2 = arith.constant 0 : index
    %c0_3 = arith.constant 0 : index
    %2 = vector.load %arg2[%c0_2, %c0_3] : memref<32x128xf32, #tpu.memory_space<vmem>>, vector<32x128xf32>
    %cst = arith.constant dense<0.000000e+00> : vector<800x128xf32>
    %3 = tpu.matmul %1, %2, %cst {dimension_numbers = #tpu.dot_dimension_numbers<[1], [0], [0], [1], [0, 0, 1, 1], [], []>} : vector<800x32xf32>, vector<32x128xf32>, vector<800x128xf32> -> vector<800x128xf32>
    %4 = vector.extract_strided_slice %3 {offsets = [0, 0], sizes = [200, 128], strides = [1, 1]} : vector<800x128xf32> to vector<200x128xf32>
    %5 = vector.extract_strided_slice %3 {offsets = [200, 0], sizes = [200, 128], strides = [1, 1]} : vector<800x128xf32> to vector<200x128xf32>
    %6 = arith.maximumf %4, %5 : vector<200x128xf32>
    %7 = vector.extract_strided_slice %3 {offsets = [400, 0], sizes = [200, 128], strides = [1, 1]} : vector<800x128xf32> to vector<200x128xf32>
    %8 = vector.extract_strided_slice %3 {offsets = [600, 0], sizes = [200, 128], strides = [1, 1]} : vector<800x128xf32> to vector<200x128xf32>
    %9 = arith.maximumf %7, %8 : vector<200x128xf32>
    %10 = arith.maximumf %6, %9 : vector<200x128xf32>
    %c0_4 = arith.constant 0 : index
    %c0_5 = arith.constant 0 : index
    %11 = vector.load %arg3[%c0_4, %c0_5] : memref<1x128xf32, #tpu.memory_space<vmem>>, vector<1x128xf32>
    %12 = vector.broadcast %11 : vector<1x128xf32> to vector<200x128xf32>
    %13 = arith.addf %10, %12 : vector<200x128xf32>
    %cst_6 = arith.constant 0.000000e+00 : f32
    %14 = vector.broadcast %cst_6 : f32 to vector<200x128xf32>
    %15 = arith.maximumf %13, %14 : vector<200x128xf32>
    %c0_7 = arith.constant 0 : index
    %c0_8 = arith.constant 0 : index
    %c0_9 = arith.constant 0 : index
    %16 = vector.load %arg4[%c0_7, %c0_8, %c0_9] : memref<1x200x128xf32, #tpu.memory_space<vmem>>, vector<1x200x128xf32>
    %17 = vector.shape_cast %16 : vector<1x200x128xf32> to vector<200x128xf32>
    %18 = vector.shape_cast %15 : vector<200x128xf32> to vector<1x200x128xf32>
    tpu.vector_store %arg4[%c0_7, %c0_8, %c0_9], %18 {strides = array<i32>} : memref<1x200x128xf32, #tpu.memory_space<vmem>>, vector<1x200x128xf32>,
    return
  }
  func.func @transform_0(%arg0: i32) -> (i32, i32, i32) {
    %c0_i32 = arith.constant 0 : i32
    %c0_i32_0 = arith.constant 0 : i32
    %c0_i32_1 = arith.constant 0 : i32
    return %arg0, %c0_i32, %c0_i32_0 : i32, i32, i32
  }
  func.func @transform_1(%arg0: i32) -> (i32, i32) {
    %c0_i32 = arith.constant 0 : i32
    %c0_i32_0 = arith.constant 0 : i32
    %c0_i32_1 = arith.constant 0 : i32
    return %c0_i32, %c0_i32_0 : i32, i32
  }
  func.func @transform_2(%arg0: i32) -> (i32, i32) {
    %c0_i32 = arith.constant 0 : i32
    %c0_i32_0 = arith.constant 0 : i32
    %c0_i32_1 = arith.constant 0 : i32
    return %c0_i32, %c0_i32_0 : i32, i32
  }
  func.func @transform_3(%arg0: i32) -> (i32, i32, i32) {
    %c0_i32 = arith.constant 0 : i32
    %c0_i32_0 = arith.constant 0 : i32
    %c0_i32_1 = arith.constant 0 : i32
    return %arg0, %c0_i32, %c0_i32_0 : i32, i32, i32
  }
}

</mosaic_0001>

<bundles_post_ra>
// kernel: tpu_custom_call.1
= control target key start
LH: loop header
LB: loop body
LE: loop exit
PB: predicated region body
PF: predicated region fallthrough
CT: control target
= control target key end

     0   :  { %8 = vsyncpa [#allocation3], 0  ;;  %s2396_s0 = inlined_call_operand.vmem [shape: f32[2,800,32], index: 0, kind: input, shape index: {}]   ;;  %s2397_s1 = inlined_call_operand.vmem [shape: f32[32,128], index: 1, kind: input, shape index: {}]   ;;  %s2398_s2 = inlined_call_operand.vmem [shape: f32[1,128], index: 2, kind: input, shape index: {}]   ;;  %s2399_s3 = inlined_call_operand.hbm [shape: f32[2,200,128], index: 3, kind: output, shape index: {}]  }
   0x1   :  { %10 = vsyncpa [#allocation3 + $0x1], 0  ;;  %s1880_s12 = smov 0   ;;  %s1882_s13 = smov 0  }
   0x2   :  { %s1884_s14 = smov 0   ;;  %s1886_s15 = smov 0  }
   0x3 LB: > { %s1901_s16 = sadd.s32 4294967295, %s1855_s15   ;;  %s1372_s17 = sadd.s32 4294967294, %s1855_s15   ;;  %s1855_s15 = sphi %s1886_s15, %s2407_s15   ;;  %s1851_s14 = sphi %s1884_s14, %s2406_s14   ;;  %s1847_s13 = sphi %s1882_s13, %s2405_s13   ;;  %s1843_s12 = sphi %s1880_s12, %s2404_s12  }
   0x4   : > { %s1905_s18 = sadd.s32 1, %s1855_s15   ;;  %s91_s19 = sadd.s32 1, %s1851_s14 }
   0x5   : > { %s88_s20 = ssub.s32 %s1855_s15, %s1905_s18  ;;  %p101_p0 = scmp.ne.s32.totalorder %s1851_s14, %s1847_s13 }
   0x6   : > { %p89_p1 = scmp.eq.s32.totalorder %s88_s20, 0  ;;  %p102_p2 = scmp.eq.s32.totalorder %s1901_s16, 1 }
   0x7   : > { %p107_p3 = scmp.ne.s32.totalorder %s1847_s13, %s1843_s12  ;;  %p108_p4 = scmp.eq.s32.totalorder %s1372_s17, 1 }
   0x8   : > { %s1916_s21 = scalar_select %p89_p1, %s1851_s14, %s91_s19  }
   0x9   : > { %p1918_p5 = por %p102_p2, %p101_p0  ;;  %p1922_p6 = por %p108_p4, %p107_p3 }
   0xa   : > { %p1375_p7 = scmp.ge.s32.totalorder %s1855_s15, 1  ;;  %p140_p8 = scmp.lt.s32.totalorder %s1855_s15, 3 }
   0xc   : > { %p141_p9 = pnand %p1375_p7, %p140_p8 }
   0xe   : > { %144 = sbr.rel (%p141_p9) target bundleno = 343 (0x157), region = 32 }
  0x13   : > { %v272_v0 = vld [vmem:[%s2397_s1 + $0x18] sm:$0xff]  ;;  %v271_v1 = vld [vmem:[%s2397_s1 + $0x10] sm:$0xff]  ;;  %p164_p10 = scmp.lt.s32.totalorder %s1901_s16, 1  ;;  %v270_v2 = vld [vmem:[%s2397_s1 + $0x8] sm:$0xff]  ;;  %vm273_vm0 = vcmask 261120   ;;  %s161_s10 = sand.u32 1, %s1847_s13  }
  0x14   : > { %1585 = vmatprep.subr.mxu0 %v272_v0  ;;  %1743 = vmatprep.subr.mxu1 %v272_v0  ;;  %v269_v3 = vld [vmem:[%s2397_s1] sm:$0xff]  ;;  %s1751_s11 = smul.u32 200, %s161_s10 }
  0x15   : > { %1586 = vmatpush3.msra.mxu0 %v272_v0  ;;  %1747 = vmatpush3.msra.mxu1 %v272_v0  ;;  %s165_s30 = scalar_select %p164_p10, %s1901_s16, 1 }
  0x16   : > { %1587 = vmatprep.subr.mxu0 %v271_v1  ;;  %1744 = vmatprep.subr.mxu1 %v271_v1  ;;  %s2250_s20 = scalar_lea.vmem [#allocation2], %s1751_s11  ;;  %s1753_s24 = smul.u32 3200, %s1901_s16 }
  0x17   : > { %1588 = vmatpush3.msra.mxu0 %v271_v1  ;;  %1748 = vmatpush3.msra.mxu1 %v271_v1  ;;  %s1752_s6 = smul.u32 800, %s165_s30  ;;  %s1310_s25 = sshll.u32 %s2250_s20, 4  ;;  %s2351_s25 = int_to_ptr.vmem [resolvable:$true] %s1310_s25 }
  0x18   : > { %1589 = vmatprep.subr.mxu0 %v270_v2  ;;  %1745 = vmatprep.subr.mxu1 %v270_v2  ;;  %s2349_s28 = scalar_lea.hbm %s2399_s3, %s1753_s24  ;;  %s2356_s16 = scalar_lea.sflag [#allocation3], %s161_s10 }
  0x19   : > { %1590 = vmatpush3.msra.mxu0 %v270_v2  ;;  %1749 = vmatpush3.msra.mxu1 %v270_v2  ;;  %s1945_s9 = scalar_lea.vmem %s2396_s0, %s1752_s6  ;;  %s1795_s29 = scalar_lea.vmem %s2351_s25, 3200 }
  0x1a   : > { %1591 = vmatprep.subr.mxu0 %v269_v3  ;;  %1746 = vmatprep.subr.mxu1 %v269_v3  ;;  %v169_v4 = vld [vmem:[%s1945_s9] sm:$0xff]  ;;  %v219_v5 = vld [vmem:[%s1945_s9 + $0x190] sm:$0xff]  ;;  %v170_v6 = vld [vmem:[%s1945_s9 + $0x8] sm:$0xff]  ;;  %p1796_p11 = scmp.ne.s32.totalorder %s2351_s25, %s1795_s29  ;;  %s1857_s30 = smov [#allocation2]  }
  0x1b   : > { %1592 = vmatpush3.msra.mxu0 %v269_v3  ;;  %1750 = vmatpush3.msra.mxu1 %v269_v3  ;;  %v220_v7 = vld [vmem:[%s1945_s9 + $0x198] sm:$0xff]  ;;  %v171_v8 = vld [vmem:[%s1945_s9 + $0x10] sm:$0xff]  ;;  %v221_v9 = vld [vmem:[%s1945_s9 + $0x1a0] sm:$0xff]  ;;  %s1799_s4 = sshll.u32 %s1857_s30, 4  ;;  %s1800_s4 = int_to_ptr.vmem [resolvable:$false] %s1799_s4 }
  0x1c   : > { %1593 = vmatprep.mubr.msk.f32.mxu0 %vm273_vm0, %v169_v4  ;;  %1668 = vmatprep.mubr.msk.f32.mxu1 %vm273_vm0, %v219_v5  ;;  %v172_v10 = vld [vmem:[%s1945_s9 + $0x18] sm:$0xff]  ;;  %v222_v11 = vld [vmem:[%s1945_s9 + $0x1a8] sm:$0xff]  ;;  %v173_v12 = vld [vmem:[%s1945_s9 + $0x20] sm:$0xff]  ;;  %p1797_p12 = pnand %p1796_p11, %p1918_p5  ;;  %s1801_s5 = scalar_lea.vmem %s1800_s4, 6400 }
  0x1d   : > { %1594 = vmatmul.mubr.msk.f32.vlgmr.msra.gmra.mxu0 %vm273_vm0, %v170_v6  ;;  %1669 = vmatmul.mubr.msk.f32.vlgmr.msra.gmra.mxu1 %vm273_vm0, %v220_v7  ;;  %v223_v13 = vld [vmem:[%s1945_s9 + $0x1b0] sm:$0xff]  ;;  %v174_v14 = vld [vmem:[%s1945_s9 + $0x28] sm:$0xff]  ;;  %v224_v15 = vld [vmem:[%s1945_s9 + $0x1b8] sm:$0xff]  ;;  %p1802_p0 = scmp.lt.s32.totalorder %s2351_s25, %s1800_s4  ;;  %p1803_p1 = scmp.lt.s32.totalorder %s1801_s5, %s1795_s29 }
  0x1e   : > { %1596 = vmatprep.mubr.msk.f32.mxu0 %vm273_vm0, %v171_v8  ;;  %1671 = vmatprep.mubr.msk.f32.mxu1 %vm273_vm0, %v221_v9  ;;  %v175_v16 = vld [vmem:[%s1945_s9 + $0x30] sm:$0xff]  ;;  %v225_v17 = vld [vmem:[%s1945_s9 + $0x1c0] sm:$0xff]  ;;  %v176_v18 = vld [vmem:[%s1945_s9 + $0x38] sm:$0xff]  ;;  %p1798_p13 = pneg %p1797_p12 }
  0x1f   : > { %v226_v19 = vld [vmem:[%s1945_s9 + $0x1c8] sm:$0xff]  ;;  %v177_v20 = vld [vmem:[%s1945_s9 + $0x40] sm:$0xff]  ;;  %v227_v21 = vld [vmem:[%s1945_s9 + $0x1d0] sm:$0xff]  ;;  %p1804_p2 = por %p1803_p1, %p1802_p0 }
  0x20   : > { %v178_v22 = vld [vmem:[%s1945_s9 + $0x48] sm:$0xff]  ;;  %v228_v23 = vld [vmem:[%s1945_s9 + $0x1d8] sm:$0xff]  ;;  %v179_v24 = vld [vmem:[%s1945_s9 + $0x50] sm:$0xff] }
  0x21   : > { %1597 = vmatmul.mubr.msk.f32.gmra.mxu0 %vm273_vm0, %v172_v10  ;;  %1672 = vmatmul.mubr.msk.f32.gmra.mxu1 %vm273_vm0, %v222_v11  ;;  %v229_v25 = vld [vmem:[%s1945_s9 + $0x1e0] sm:$0xff]  ;;  %v180_v26 = vld [vmem:[%s1945_s9 + $0x58] sm:$0xff]  ;;  %v230_v27 = vld [vmem:[%s1945_s9 + $0x1e8] sm:$0xff]  ;;  %p1805_p3 = pnand %p1804_p2, %p1798_p13 }
  0x22   : > { %1599 = vmatprep.mubr.msk.f32.mxu0 %vm273_vm0, %v173_v12  ;;  %1674 = vmatprep.mubr.msk.f32.mxu1 %vm273_vm0, %v223_v13  ;;  %v181_v28 = vld [vmem:[%s1945_s9 + $0x60] sm:$0xff]  ;;  %v231_v29 = vld [vmem:[%s1945_s9 + $0x1f0] sm:$0xff]  ;;  %v182_v30 = vld [vmem:[%s1945_s9 + $0x68] sm:$0xff] }
  0x23   : > { %v232_v31 = vld [vmem:[%s1945_s9 + $0x1f8] sm:$0xff]  ;;  %v183_v32 = vld [vmem:[%s1945_s9 + $0x70] sm:$0xff]  ;;  %v233_v33 = vld [vmem:[%s1945_s9 + $0x200] sm:$0xff] }
  0x24   : > { %v184_v34 = vld [vmem:[%s1945_s9 + $0x78] sm:$0xff]  ;;  %v234_v35 = vld [vmem:[%s1945_s9 + $0x208] sm:$0xff]  ;;  %v185_v36 = vld [vmem:[%s1945_s9 + $0x80] sm:$0xff] }
  0x25   : > { %1600 = vmatmul.mubr.msk.f32.gmra.mxu0 %vm273_vm0, %v174_v14  ;;  %1675 = vmatmul.mubr.msk.f32.gmra.mxu1 %vm273_vm0, %v224_v15  ;;  %v235_v37 = vld [vmem:[%s1945_s9 + $0x210] sm:$0xff]  ;;  %v186_v38 = vld [vmem:[%s1945_s9 + $0x88] sm:$0xff]  ;;  %v236_v39 = vld [vmem:[%s1945_s9 + $0x218] sm:$0xff] }
  0x26   : > { %1602 = vmatprep.mubr.msk.f32.mxu0 %vm273_vm0, %v175_v16  ;;  %1677 = vmatprep.mubr.msk.f32.mxu1 %vm273_vm0, %v225_v17  ;;  %v187_v40 = vld [vmem:[%s1945_s9 + $0x90] sm:$0xff]  ;;  %v237_v41 = vld [vmem:[%s1945_s9 + $0x220] sm:$0xff]  ;;  %v188_v42 = vld [vmem:[%s1945_s9 + $0x98] sm:$0xff] }
  0x27   : > { %v238_v43 = vld [vmem:[%s1945_s9 + $0x228] sm:$0xff]  ;;  %v189_v44 = vld [vmem:[%s1945_s9 + $0xa0] sm:$0xff]  ;;  %v239_v45 = vld [vmem:[%s1945_s9 + $0x230] sm:$0xff] }
  0x28   : > { %v190_v46 = vld [vmem:[%s1945_s9 + $0xa8] sm:$0xff]  ;;  %v240_v47 = vld [vmem:[%s1945_s9 + $0x238] sm:$0xff]  ;;  %v191_v48 = vld [vmem:[%s1945_s9 + $0xb0] sm:$0xff] }
  0x29   : > { %1603 = vmatmul.mubr.msk.f32.gmra.mxu0 %vm273_vm0, %v176_v18  ;;  %1678 = vmatmul.mubr.msk.f32.gmra.mxu1 %vm273_vm0, %v226_v19  ;;  %v241_v49 = vld [vmem:[%s1945_s9 + $0x240] sm:$0xff]  ;;  %v192_v50 = vld [vmem:[%s1945_s9 + $0xb8] sm:$0xff]  ;;  %v242_v51 = vld [vmem:[%s1945_s9 + $0x248] sm:$0xff] }
  0x2a   : > { %1605 = vmatprep.mubr.msk.f32.mxu0 %vm273_vm0, %v177_v20  ;;  %1680 = vmatprep.mubr.msk.f32.mxu1 %vm273_vm0, %v227_v21  ;;  %v193_v52 = vld [vmem:[%s1945_s9 + $0xc0] sm:$0xff]  ;;  %v243_v53 = vld [vmem:[%s1945_s9 + $0x250] sm:$0xff]  ;;  %v194_v54 = vld [vmem:[%s1945_s9 + $0xc8] sm:$0xff] }
  0x2b   : > { %v244_v55 = vld [vmem:[%s1945_s9 + $0x258] sm:$0xff]  ;;  %v195_v56 = vld [vmem:[%s1945_s9 + $0xd0] sm:$0xff]  ;;  %v245_v57 = vld [vmem:[%s1945_s9 + $0x260] sm:$0xff] }
  0x2c   : > { %v196_v58 = vld [vmem:[%s1945_s9 + $0xd8] sm:$0xff]  ;;  %v246_v59 = vld [vmem:[%s1945_s9 + $0x268] sm:$0xff]  ;;  %v197_v60 = vld [vmem:[%s1945_s9 + $0xe0] sm:$0xff] }
  0x2d   : > { %1606 = vmatmul.mubr.msk.f32.gmra.mxu0 %vm273_vm0, %v178_v22  ;;  %1681 = vmatmul.mubr.msk.f32.gmra.mxu1 %vm273_vm0, %v228_v23  ;;  %v247_v61 = vld [vmem:[%s1945_s9 + $0x270] sm:$0xff]  ;;  %v198_v62 = vld [vmem:[%s1945_s9 + $0xe8] sm:$0xff]  ;;  %v248_v63 = vld [vmem:[%s1945_s9 + $0x278] sm:$0xff] }
  0x2e   : > { %1608 = vmatprep.mubr.msk.f32.mxu0 %vm273_vm0, %v179_v24  ;;  %1683 = vmatprep.mubr.msk.f32.mxu1 %vm273_vm0, %v229_v25  ;;  %v199_v0 = vld [vmem:[%s1945_s9 + $0xf0] sm:$0xff]  ;;  %v249_v1 = vld [vmem:[%s1945_s9 + $0x280] sm:$0xff]  ;;  %v200_v2 = vld [vmem:[%s1945_s9 + $0xf8] sm:$0xff] }
  0x2f   : > { %v250_v3 = vld [vmem:[%s1945_s9 + $0x288] sm:$0xff]  ;;  %v201_v4 = vld [vmem:[%s1945_s9 + $0x100] sm:$0xff]  ;;  %v251_v5 = vld [vmem:[%s1945_s9 + $0x290] sm:$0xff] }
  0x30   : > { %v202_v6 = vld [vmem:[%s1945_s9 + $0x108] sm:$0xff]  ;;  %v252_v7 = vld [vmem:[%s1945_s9 + $0x298] sm:$0xff]  ;;  %v203_v8 = vld [vmem:[%s1945_s9 + $0x110] sm:$0xff] }
  0x31   : > { %1609 = vmatmul.mubr.msk.f32.gmra.mxu0 %vm273_vm0, %v180_v26  ;;  %1684 = vmatmul.mubr.msk.f32.gmra.mxu1 %vm273_vm0, %v230_v27  ;;  %v253_v9 = vld [vmem:[%s1945_s9 + $0x2a0] sm:$0xff]  ;;  %v204_v10 = vld [vmem:[%s1945_s9 + $0x118] sm:$0xff]  ;;  %v254_v11 = vld [vmem:[%s1945_s9 + $0x2a8] sm:$0xff] }
  0x32   : > { %1611 = vmatprep.mubr.msk.f32.mxu0 %vm273_vm0, %v181_v28  ;;  %1686 = vmatprep.mubr.msk.f32.mxu1 %vm273_vm0, %v231_v29  ;;  %v205_v12 = vld [vmem:[%s1945_s9 + $0x120] sm:$0xff]  ;;  %v255_v13 = vld [vmem:[%s1945_s9 + $0x2b0] sm:$0xff]  ;;  %v206_v14 = vld [vmem:[%s1945_s9 + $0x128] sm:$0xff] }
  0x33   : > { %v256_v15 = vld [vmem:[%s1945_s9 + $0x2b8] sm:$0xff]  ;;  %v207_v16 = vld [vmem:[%s1945_s9 + $0x130] sm:$0xff]  ;;  %v257_v17 = vld [vmem:[%s1945_s9 + $0x2c0] sm:$0xff] }
  0x34   : > { %v208_v18 = vld [vmem:[%s1945_s9 + $0x138] sm:$0xff]  ;;  %v258_v19 = vld [vmem:[%s1945_s9 + $0x2c8] sm:$0xff]  ;;  %v209_v20 = vld [vmem:[%s1945_s9 + $0x140] sm:$0xff] }
  0x35   : > { %1612 = vmatmul.mubr.msk.f32.gmra.mxu0 %vm273_vm0, %v182_v30  ;;  %1687 = vmatmul.mubr.msk.f32.gmra.mxu1 %vm273_vm0, %v232_v31  ;;  %v259_v21 = vld [vmem:[%s1945_s9 + $0x2d0] sm:$0xff]  ;;  %v210_v22 = vld [vmem:[%s1945_s9 + $0x148] sm:$0xff]  ;;  %v260_v23 = vld [vmem:[%s1945_s9 + $0x2d8] sm:$0xff] }
  0x36   : > { %1614 = vmatprep.mubr.msk.f32.mxu0 %vm273_vm0, %v183_v32  ;;  %1689 = vmatprep.mubr.msk.f32.mxu1 %vm273_vm0, %v233_v33  ;;  %v211_v24 = vld [vmem:[%s1945_s9 + $0x150] sm:$0xff]  ;;  %v261_v25 = vld [vmem:[%s1945_s9 + $0x2e0] sm:$0xff]  ;;  %v212_v26 = vld [vmem:[%s1945_s9 + $0x158] sm:$0xff] }
  0x37   : > { %v262_v27 = vld [vmem:[%s1945_s9 + $0x2e8] sm:$0xff]  ;;  %v213_v28 = vld [vmem:[%s1945_s9 + $0x160] sm:$0xff]  ;;  %v263_v29 = vld [vmem:[%s1945_s9 + $0x2f0] sm:$0xff] }
  0x38   : > { %v214_v30 = vld [vmem:[%s1945_s9 + $0x168] sm:$0xff]  ;;  %v264_v31 = vld [vmem:[%s1945_s9 + $0x2f8] sm:$0xff]  ;;  %v215_v32 = vld [vmem:[%s1945_s9 + $0x170] sm:$0xff] }
  0x39   : > { %1615 = vmatmul.mubr.msk.f32.gmra.mxu0 %vm273_vm0, %v184_v34  ;;  %1690 = vmatmul.mubr.msk.f32.gmra.mxu1 %vm273_vm0, %v234_v35  ;;  %v265_v33 = vld [vmem:[%s1945_s9 + $0x300] sm:$0xff]  ;;  %v216_v34 = vld [vmem:[%s1945_s9 + $0x178] sm:$0xff]  ;;  %v266_v35 = vld [vmem:[%s1945_s9 + $0x308] sm:$0xff] }
  0x3a   : > { %1617 = vmatprep.mubr.msk.f32.mxu0 %vm273_vm0, %v185_v36  ;;  %1692 = vmatprep.mubr.msk.f32.mxu1 %vm273_vm0, %v235_v37  ;;  %v217_v36 = vld [vmem:[%s1945_s9 + $0x180] sm:$0xff]  ;;  %v267_v37 = vld [vmem:[%s1945_s9 + $0x310] sm:$0xff] }
  0x3d   : > { %1618 = vmatmul.mubr.msk.f32.gmra.mxu0 %vm273_vm0, %v186_v38  ;;  %1693 = vmatmul.mubr.msk.f32.gmra.mxu1 %vm273_vm0, %v236_v39  ;;  %v218_v38 = vld [vmem:[%s1945_s9 + $0x188] sm:$0xff]  ;;  %v268_v39 = vld [vmem:[%s1945_s9 + $0x318] sm:$0xff] }
  0x3e   : > { %1620 = vmatprep.mubr.msk.f32.mxu0 %vm273_vm0, %v187_v40  ;;  %1695 = vmatprep.mubr.msk.f32.mxu1 %vm273_vm0, %v237_v41 }
  0x41   : > { %1621 = vmatmul.mubr.msk.f32.gmra.mxu0 %vm273_vm0, %v188_v42  ;;  %1696 = vmatmul.mubr.msk.f32.gmra.mxu1 %vm273_vm0, %v238_v43 }
  0x42   : > { %1623 = vmatprep.mubr.msk.f32.mxu0 %vm273_vm0, %v189_v44  ;;  %1698 = vmatprep.mubr.msk.f32.mxu1 %vm273_vm0, %v239_v45 }
  0x45   : > { %1624 = vmatmul.mubr.msk.f32.gmra.mxu0 %vm273_vm0, %v190_v46  ;;  %1699 = vmatmul.mubr.msk.f32.gmra.mxu1 %vm273_vm0, %v240_v47 }
  0x46   : > { %1626 = vmatprep.mubr.msk.f32.mxu0 %vm273_vm0, %v191_v48  ;;  %1701 = vmatprep.mubr.msk.f32.mxu1 %vm273_vm0, %v241_v49 }
  0x49   : > { %1627 = vmatmul.mubr.msk.f32.gmra.mxu0 %vm273_vm0, %v192_v50  ;;  %1702 = vmatmul.mubr.msk.f32.gmra.mxu1 %vm273_vm0, %v242_v51 }
  0x4a   : > { %1629 = vmatprep.mubr.msk.f32.mxu0 %vm273_vm0, %v193_v52  ;;  %1704 = vmatprep.mubr.msk.f32.mxu1 %vm273_vm0, %v243_v53 }
  0x4d   : > { %1630 = vmatmul.mubr.msk.f32.gmra.mxu0 %vm273_vm0, %v194_v54  ;;  %1705 = vmatmul.mubr.msk.f32.gmra.mxu1 %vm273_vm0, %v244_v55 }
  0x4e   : > { %1632 = vmatprep.mubr.msk.f32.mxu0 %vm273_vm0, %v195_v56  ;;  %1707 = vmatprep.mubr.msk.f32.mxu1 %vm273_vm0, %v245_v57 }
  0x51   : > { %1633 = vmatmul.mubr.msk.f32.gmra.mxu0 %vm273_vm0, %v196_v58  ;;  %1708 = vmatmul.mubr.msk.f32.gmra.mxu1 %vm273_vm0, %v246_v59 }
  0x52   : > { %1635 = vmatprep.mubr.msk.f32.mxu0 %vm273_vm0, %v197_v60  ;;  %1710 = vmatprep.mubr.msk.f32.mxu1 %vm273_vm0, %v247_v61 }
  0x55   : > { %1636 = vmatmul.mubr.msk.f32.gmra.mxu0 %vm273_vm0, %v198_v62  ;;  %1711 = vmatmul.mubr.msk.f32.gmra.mxu1 %vm273_vm0, %v248_v63 }
  0x56   : > { %1638 = vmatprep.mubr.msk.f32.mxu0 %vm273_vm0, %v199_v0  ;;  %1713 = vmatprep.mubr.msk.f32.mxu1 %vm273_vm0, %v249_v1 }
  0x59   : > { %1639 = vmatmul.mubr.msk.f32.gmra.mxu0 %vm273_vm0, %v200_v2  ;;  %1714 = vmatmul.mubr.msk.f32.gmra.mxu1 %vm273_vm0, %v250_v3 }
  0x5a   : > { %1641 = vmatprep.mubr.msk.f32.mxu0 %vm273_vm0, %v201_v4  ;;  %1716 = vmatprep.mubr.msk.f32.mxu1 %vm273_vm0, %v251_v5 }
  0x5d   : > { %1642 = vmatmul.mubr.msk.f32.gmra.mxu0 %vm273_vm0, %v202_v6  ;;  %1717 = vmatmul.mubr.msk.f32.gmra.mxu1 %vm273_vm0, %v252_v7 }
  0x5e   : > { %1644 = vmatprep.mubr.msk.f32.mxu0 %vm273_vm0, %v203_v8  ;;  %1719 = vmatprep.mubr.msk.f32.mxu1 %vm273_vm0, %v253_v9 }
  0x61   : > { %1645 = vmatmul.mubr.msk.f32.gmra.mxu0 %vm273_vm0, %v204_v10  ;;  %1720 = vmatmul.mubr.msk.f32.gmra.mxu1 %vm273_vm0, %v254_v11 }
  0x62   : > { %1647 = vmatprep.mubr.msk.f32.mxu0 %vm273_vm0, %v205_v12  ;;  %1722 = vmatprep.mubr.msk.f32.mxu1 %vm273_vm0, %v255_v13 }
  0x65   : > { %1648 = vmatmul.mubr.msk.f32.gmra.mxu0 %vm273_vm0, %v206_v14  ;;  %1723 = vmatmul.mubr.msk.f32.gmra.mxu1 %vm273_vm0, %v256_v15 }
  0x66   : > { %1650 = vmatprep.mubr.msk.f32.mxu0 %vm273_vm0, %v207_v16  ;;  %1725 = vmatprep.mubr.msk.f32.mxu1 %vm273_vm0, %v257_v17 }
  0x69   : > { %1651 = vmatmul.mubr.msk.f32.gmra.mxu0 %vm273_vm0, %v208_v18  ;;  %1726 = vmatmul.mubr.msk.f32.gmra.mxu1 %vm273_vm0, %v258_v19 }
  0x6a   : > { %1653 = vmatprep.mubr.msk.f32.mxu0 %vm273_vm0, %v209_v20  ;;  %1728 = vmatprep.mubr.msk.f32.mxu1 %vm273_vm0, %v259_v21 }
  0x6d   : > { %1654 = vmatmul.mubr.msk.f32.gmra.mxu0 %vm273_vm0, %v210_v22  ;;  %1729 = vmatmul.mubr.msk.f32.gmra.mxu1 %vm273_vm0, %v260_v23 }
  0x6e   : > { %1656 = vmatprep.mubr.msk.f32.mxu0 %vm273_vm0, %v211_v24  ;;  %1731 = vmatprep.mubr.msk.f32.mxu1 %vm273_vm0, %v261_v25 }
  0x71   : > { %1657 = vmatmul.mubr.msk.f32.gmra.mxu0 %vm273_vm0, %v212_v26  ;;  %1732 = vmatmul.mubr.msk.f32.gmra.mxu1 %vm273_vm0, %v262_v27 }
  0x72   : > { %1659 = vmatprep.mubr.msk.f32.mxu0 %vm273_vm0, %v213_v28  ;;  %1734 = vmatprep.mubr.msk.f32.mxu1 %vm273_vm0, %v263_v29  ;;  %v2241_v28 = vld [vmem:[%s2398_s2] ss:$0 sm:$0xff] }
  0x75   : > { %1660 = vmatmul.mubr.msk.f32.gmra.mxu0 %vm273_vm0, %v214_v30  ;;  %1735 = vmatmul.mubr.msk.f32.gmra.mxu1 %vm273_vm0, %v264_v31 }
  0x76   : > { %1662 = vmatprep.mubr.msk.f32.mxu0 %vm273_vm0, %v215_v32  ;;  %1737 = vmatprep.mubr.msk.f32.mxu1 %vm273_vm0, %v265_v33 }
  0x79   : > { %1663 = vmatmul.mubr.msk.f32.gmra.mxu0 %vm273_vm0, %v216_v34  ;;  %1738 = vmatmul.mubr.msk.f32.gmra.mxu1 %vm273_vm0, %v266_v35 }
  0x7a   : > { %1665 = vmatprep.mubr.msk.f32.mxu0 %vm273_vm0, %v217_v36  ;;  %1740 = vmatprep.mubr.msk.f32.mxu1 %vm273_vm0, %v267_v37 }
  0x7d   : > { %1666 = vmatmul.mubr.msk.f32.gmra.mxu0 %vm273_vm0, %v218_v38  ;;  %1741 = vmatmul.mubr.msk.f32.gmra.mxu1 %vm273_vm0, %v268_v39 }
  0xdd   : > { %v2147_v40 = vpop.f32.mrf.mxu0  ;;  %v2149_v41 = vpop.f32.mrf.mxu1 }
  0xdf   : > { %v640_v42 = vpop.f32.mrf.mxu0  ;;  %v890_v43 = vpop.f32.mrf.mxu1 }
  0xe1   : > { %v2151_v44 = vpop.f32.mrf.mxu0  ;;  %v2153_v45 = vpop.f32.mrf.mxu1 }
  0xe3   : > { %v650_v46 = vpop.f32.mrf.mxu0  ;;  %v900_v47 = vpop.f32.mrf.mxu1 }
  0xe5   : > { %v2155_v48 = vpop.f32.mrf.mxu0  ;;  %v2157_v49 = vpop.f32.mrf.mxu1 }
  0xe7   : > { %v2159_v50 = vpop.f32.mrf.mxu0  ;;  %v2161_v51 = vpop.f32.mrf.mxu1 }
  0xe9   : > { %v2163_v52 = vpop.f32.mrf.mxu0  ;;  %v2165_v53 = vpop.f32.mrf.mxu1 }
  0xeb   : > { %v2167_v54 = vpop.f32.mrf.mxu0  ;;  %v2169_v55 = vpop.f32.mrf.mxu1 }
  0xed   : > { %v2171_v56 = vpop.f32.mrf.mxu0  ;;  %v2173_v57 = vpop.f32.mrf.mxu1 }
  0xef   : > { %v2175_v58 = vpop.f32.mrf.mxu0  ;;  %v2177_v59 = vpop.f32.mrf.mxu1 }
  0xf1   : > { %v2179_v60 = vpop.f32.mrf.mxu0  ;;  %v2181_v61 = vpop.f32.mrf.mxu1 }
  0xf3   : > { %v2183_v62 = vpop.f32.mrf.mxu0  ;;  %v2185_v63 = vpop.f32.mrf.mxu1 }
  0xf5   : > { %v2187_v0 = vpop.f32.mrf.mxu0  ;;  %v2189_v1 = vpop.f32.mrf.mxu1 }
  0xf7   : > { %v2191_v2 = vpop.f32.mrf.mxu0  ;;  %v2193_v3 = vpop.f32.mrf.mxu1 }
  0xf9   : > { %v2195_v4 = vpop.f32.mrf.mxu0  ;;  %v2197_v5 = vpop.f32.mrf.mxu1 }
  0xfb   : > { %v2199_v6 = vpop.f32.mrf.mxu0  ;;  %v2201_v7 = vpop.f32.mrf.mxu1 }
  0xfd   : > { %v2203_v8 = vpop.f32.mrf.mxu0  ;;  %v2205_v9 = vpop.f32.mrf.mxu1 }
  0xff   : > { %v2207_v10 = vpop.f32.mrf.mxu0  ;;  %v2209_v11 = vpop.f32.mrf.mxu1 }
 0x101   : > { %v2211_v12 = vpop.f32.mrf.mxu0  ;;  %v2213_v13 = vpop.f32.mrf.mxu1 }
 0x103   : > { %v2215_v14 = vpop.f32.mrf.mxu0  ;;  %v2217_v15 = vpop.f32.mrf.mxu1 }
 0x105   : > { %v2219_v16 = vpop.f32.mrf.mxu0  ;;  %v2221_v17 = vpop.f32.mrf.mxu1 }
 0x107   : > { %v2223_v18 = vpop.f32.mrf.mxu0  ;;  %v2225_v19 = vpop.f32.mrf.mxu1 }
 0x109   : > { %v2227_v20 = vpop.f32.mrf.mxu0  ;;  %v2229_v21 = vpop.f32.mrf.mxu1 }
 0x10a   : > { %2402 = vst [vmem:[#allocation5_spill] sm:$0xff] %v2229_v21 }
 0x10b   : > { %v2231_v22 = vpop.f32.mrf.mxu0  ;;  %v2233_v23 = vpop.f32.mrf.mxu1 }
 0x10d   : > { %v1631_v24 = vpop.f32.mrf.mxu0  ;;  %v1706_v25 = vpop.f32.mrf.mxu1 }
 0x10e   : > { %v1139_v26 = vmax.f32 %v640_v42, %v1631_v24  ;;  %v1164_v27 = vmax.f32 %v890_v43, %v1706_v25 }
 0x10f   : > { %v2243_v29 = vpop.f32.mrf.mxu0  ;;  %v2245_v30 = vpop.f32.mrf.mxu1 }
 0x110   : > { %v1189_v31 = vmax.f32 %v1139_v26, %v1164_v27 }
 0x111   : > { %v1634_v32 = vpop.f32.mrf.mxu0  ;;  %v1709_v33 = vpop.f32.mrf.mxu1 }
 0x112   : > { %v1221_v34 = vadd.f32 %v2241_v28, %v1189_v31  ;;  %v1141_v35 = vmax.f32 %v650_v46, %v1634_v32  ;;  %v1166_v36 = vmax.f32 %v900_v47, %v1709_v33 }
 0x113   : > { %v770_v37 = vpop.f32.mrf.mxu0  ;;  %v1020_v38 = vpop.f32.mrf.mxu1 }
 0x114   : > { %v1246_v39 = vmax.f32 %v1221_v34, 0.0  ;;  %v1191_v42 = vmax.f32 %v1141_v35, %v1166_v36  ;;  %v1140_v43 = vmax.f32 %v2147_v40, %v770_v37  ;;  %v1165_v24 = vmax.f32 %v2149_v41, %v1020_v38 }
 0x115   : > { %v1637_v25 = vpop.f32.mrf.mxu0  ;;  %v1712_v21 = vpop.f32.mrf.mxu1 }
 0x116   : > { %1271 = vst [vmem:[%s2250_s20] sm:$0xff] %v1246_v39  ;;  %v1223_v26 = vadd.f32 %v2241_v28, %v1191_v42  ;;  %v1190_v27 = vmax.f32 %v1140_v43, %v1165_v24  ;;  %v1143_v46 = vmax.f32 %v2159_v50, %v1637_v25  ;;  %v1168_v47 = vmax.f32 %v2161_v51, %v1712_v21 }
 0x117   : > { %v780_v31 = vpop.f32.mrf.mxu0  ;;  %v1030_v32 = vpop.f32.mrf.mxu1 }
 0x118   : > { %v1248_v40 = vmax.f32 %v1223_v26, 0.0  ;;  %v1222_v41 = vadd.f32 %v2241_v28, %v1190_v27  ;;  %v1193_v33 = vmax.f32 %v1143_v46, %v1168_v47  ;;  %v1142_v34 = vmax.f32 %v2151_v44, %v780_v31 }
 0x119   : > { %v1167_v35 = vmax.f32 %v2153_v45, %v1030_v32  ;;  %v1640_v36 = vpop.f32.mrf.mxu0  ;;  %v1715_v37 = vpop.f32.mrf.mxu1 }
 0x11a   : > { %1273 = vst [vmem:[%s2250_s20 + $0x10] sm:$0xff] %v1248_v40  ;;  %v1247_v38 = vmax.f32 %v1222_v41, 0.0  ;;  %v1225_v50 = vadd.f32 %v2241_v28, %v1193_v33  ;;  %v1145_v51 = vmax.f32 %v2167_v54, %v1640_v36  ;;  %v1170_v21 = vmax.f32 %v2169_v55, %v1715_v37 }
 0x11b   : > { %v1192_v39 = vmax.f32 %v1142_v34, %v1167_v35  ;;  %v790_v42 = vpop.f32.mrf.mxu0  ;;  %v1040_v43 = vpop.f32.mrf.mxu1 }
 0x11c   : > { %1272 = vst [vmem:[%s2250_s20 + $0x8] sm:$0xff] %v1247_v38  ;;  %v1250_v24 = vmax.f32 %v1225_v50, 0.0  ;;  %v1195_v25 = vmax.f32 %v1145_v51, %v1170_v21  ;;  %v1144_v44 = vmax.f32 %v2155_v48, %v790_v42  ;;  %v1169_v45 = vmax.f32 %v2157_v49, %v1040_v43 }
 0x11d   : > { %v1224_v26 = vadd.f32 %v2241_v28, %v1192_v39  ;;  %v1643_v27 = vpop.f32.mrf.mxu0  ;;  %v1718_v46 = vpop.f32.mrf.mxu1 }
 0x11e   : > { %1275 = vst [vmem:[%s2250_s20 + $0x20] sm:$0xff] %v1250_v24  ;;  %v1227_v54 = vadd.f32 %v2241_v28, %v1195_v25  ;;  %v1194_v55 = vmax.f32 %v1144_v44, %v1169_v45  ;;  %v1147_v47 = vmax.f32 %v2175_v58, %v1643_v27  ;;  %v1172_v31 = vmax.f32 %v2177_v59, %v1718_v46 }
 0x11f   : > { %v1249_v32 = vmax.f32 %v1224_v26, 0.0  ;;  %v800_v40 = vpop.f32.mrf.mxu0  ;;  %v1050_v41 = vpop.f32.mrf.mxu1 }
 0x120   : > { %v1252_v48 = vmax.f32 %v1227_v54, 0.0  ;;  %v1226_v49 = vadd.f32 %v2241_v28, %v1194_v55  ;;  %v1197_v33 = vmax.f32 %v1147_v47, %v1172_v31  ;;  %v1146_v34 = vmax.f32 %v2163_v52, %v800_v40 }
 0x121   : > { %1274 = vst [vmem:[%s2250_s20 + $0x18] sm:$0xff] %v1249_v32  ;;  %v1171_v35 = vmax.f32 %v2165_v53, %v1050_v41  ;;  %v1646_v36 = vpop.f32.mrf.mxu0  ;;  %v1721_v37 = vpop.f32.mrf.mxu1 }
 0x122   : > { %1277 = vst [vmem:[%s2250_s20 + $0x30] sm:$0xff] %v1252_v48  ;;  %v1251_v58 = vmax.f32 %v1226_v49, 0.0  ;;  %v1229_v59 = vadd.f32 %v2241_v28, %v1197_v33  ;;  %v1149_v38 = vmax.f32 %v2183_v62, %v1646_v36  ;;  %v1174_v50 = vmax.f32 %v2185_v63, %v1721_v37 }
 0x123   : > { %v1196_v51 = vmax.f32 %v1146_v34, %v1171_v35  ;;  %v810_v21 = vpop.f32.mrf.mxu0  ;;  %v1060_v39 = vpop.f32.mrf.mxu1 }
 0x124   : > { %1276 = vst [vmem:[%s2250_s20 + $0x28] sm:$0xff] %v1251_v58  ;;  %v1254_v42 = vmax.f32 %v1229_v59, 0.0  ;;  %v1199_v52 = vmax.f32 %v1149_v38, %v1174_v50  ;;  %v1148_v43 = vmax.f32 %v2171_v56, %v810_v21  ;;  %v1173_v53 = vmax.f32 %v2173_v57, %v1060_v39 }
 0x125   : > { %v1228_v24 = vadd.f32 %v2241_v28, %v1196_v51  ;;  %v1649_v25 = vpop.f32.mrf.mxu0  ;;  %v1724_v44 = vpop.f32.mrf.mxu1 }
 0x126   : > { %1279 = vst [vmem:[%s2250_s20 + $0x40] sm:$0xff] %v1254_v42  ;;  %v1231_v62 = vadd.f32 %v2241_v28, %v1199_v52  ;;  %v1198_v63 = vmax.f32 %v1148_v43, %v1173_v53  ;;  %v1151_v45 = vmax.f32 %v2191_v2, %v1649_v25  ;;  %v1176_v26 = vmax.f32 %v2193_v3, %v1724_v44 }
 0x127   : > { %v1253_v27 = vmax.f32 %v1228_v24, 0.0  ;;  %v820_v46 = vpop.f32.mrf.mxu0  ;;  %v1070_v54 = vpop.f32.mrf.mxu1 }
 0x128   : > { %v1256_v56 = vmax.f32 %v1231_v62, 0.0  ;;  %v1230_v57 = vadd.f32 %v2241_v28, %v1198_v63  ;;  %v1201_v55 = vmax.f32 %v1151_v45, %v1176_v26  ;;  %v1150_v47 = vmax.f32 %v2179_v60, %v820_v46 }
 0x129   : > { %1278 = vst [vmem:[%s2250_s20 + $0x38] sm:$0xff] %v1253_v27  ;;  %v1175_v31 = vmax.f32 %v2181_v61, %v1070_v54  ;;  %v1652_v32 = vpop.f32.mrf.mxu0  ;;  %v1727_v40 = vpop.f32.mrf.mxu1 }
 0x12a   : > { %1281 = vst [vmem:[%s2250_s20 + $0x50] sm:$0xff] %v1256_v56  ;;  %v1255_v2 = vmax.f32 %v1230_v57, 0.0  ;;  %v1233_v3 = vadd.f32 %v2241_v28, %v1201_v55  ;;  %v1153_v41 = vmax.f32 %v2199_v6, %v1652_v32  ;;  %v1178_v48 = vmax.f32 %v2201_v7, %v1727_v40 }
 0x12b   : > { %v1200_v49 = vmax.f32 %v1150_v47, %v1175_v31  ;;  %v830_v33 = vpop.f32.mrf.mxu0  ;;  %v1080_v34 = vpop.f32.mrf.mxu1 }
 0x12c   : > { %1280 = vst [vmem:[%s2250_s20 + $0x48] sm:$0xff] %v1255_v2  ;;  %v1258_v35 = vmax.f32 %v1233_v3, 0.0  ;;  %v1203_v60 = vmax.f32 %v1153_v41, %v1178_v48  ;;  %v1152_v36 = vmax.f32 %v2187_v0, %v830_v33  ;;  %v1177_v61 = vmax.f32 %v2189_v1, %v1080_v34 }
 0x12d   : > { %v1232_v37 = vadd.f32 %v2241_v28, %v1200_v49  ;;  %v1655_v58 = vpop.f32.mrf.mxu0  ;;  %v1730_v59 = vpop.f32.mrf.mxu1 }
 0x12e   : > { %1283 = vst [vmem:[%s2250_s20 + $0x60] sm:$0xff] %v1258_v35  ;;  %v1235_v6 = vadd.f32 %v2241_v28, %v1203_v60  ;;  %v1202_v7 = vmax.f32 %v1152_v36, %v1177_v61  ;;  %v1155_v38 = vmax.f32 %v2207_v10, %v1655_v58  ;;  %v1180_v50 = vmax.f32 %v2209_v11, %v1730_v59 }
 0x12f   : > { %v1257_v51 = vmax.f32 %v1232_v37, 0.0  ;;  %v840_v21 = vpop.f32.mrf.mxu0  ;;  %v1090_v39 = vpop.f32.mrf.mxu1 }
 0x130   : > { %v1260_v0 = vmax.f32 %v1235_v6, 0.0  ;;  %v1234_v1 = vadd.f32 %v2241_v28, %v1202_v7  ;;  %v1205_v42 = vmax.f32 %v1155_v38, %v1180_v50  ;;  %v1154_v52 = vmax.f32 %v2195_v4, %v840_v21 }
 0x131   : > { %1282 = vst [vmem:[%s2250_s20 + $0x58] sm:$0xff] %v1257_v51  ;;  %v1179_v43 = vmax.f32 %v2197_v5, %v1090_v39  ;;  %v1658_v53 = vpop.f32.mrf.mxu0  ;;  %v1733_v24 = vpop.f32.mrf.mxu1 }
 0x132   : > { %1285 = vst [vmem:[%s2250_s20 + $0x70] sm:$0xff] %v1260_v0  ;;  %v1259_v10 = vmax.f32 %v1234_v1, 0.0  ;;  %v1237_v11 = vadd.f32 %v2241_v28, %v1205_v42  ;;  %v1157_v25 = vmax.f32 %v2215_v14, %v1658_v53  ;;  %v1182_v44 = vmax.f32 %v2217_v15, %v1733_v24  ;;  %v2403_v0 = vld [vmem:[#allocation5_spill] sm:$0xff] }
 0x133   : > { %v1204_v62 = vmax.f32 %v1154_v52, %v1179_v43  ;;  %v850_v63 = vpop.f32.mrf.mxu0  ;;  %v1100_v45 = vpop.f32.mrf.mxu1 }
 0x134   : > { %1284 = vst [vmem:[%s2250_s20 + $0x68] sm:$0xff] %v1259_v10  ;;  %v1262_v26 = vmax.f32 %v1237_v11, 0.0  ;;  %v1207_v4 = vmax.f32 %v1157_v25, %v1182_v44  ;;  %v1156_v27 = vmax.f32 %v2203_v8, %v850_v63  ;;  %v1181_v5 = vmax.f32 %v2205_v9, %v1100_v45 }
 0x135   : > { %v1236_v46 = vadd.f32 %v2241_v28, %v1204_v62  ;;  %v1661_v54 = vpop.f32.mrf.mxu0  ;;  %v1736_v56 = vpop.f32.mrf.mxu1 }
 0x136   : > { %1287 = vst [vmem:[%s2250_s20 + $0x80] sm:$0xff] %v1262_v26  ;;  %v1239_v14 = vadd.f32 %v2241_v28, %v1207_v4  ;;  %v1206_v15 = vmax.f32 %v1156_v27, %v1181_v5  ;;  %v1159_v57 = vmax.f32 %v2223_v18, %v1661_v54  ;;  %v1184_v55 = vmax.f32 %v2225_v19, %v1736_v56 }
 0x137   : > { %v1261_v47 = vmax.f32 %v1236_v46, 0.0  ;;  %v860_v31 = vpop.f32.mrf.mxu0  ;;  %v1110_v32 = vpop.f32.mrf.mxu1 }
 0x138   : > { %v1264_v8 = vmax.f32 %v1239_v14, 0.0  ;;  %v1238_v9 = vadd.f32 %v2241_v28, %v1206_v15  ;;  %v1209_v40 = vmax.f32 %v1159_v57, %v1184_v55  ;;  %v1158_v2 = vmax.f32 %v2211_v12, %v860_v31 }
 0x139   : > { %1286 = vst [vmem:[%s2250_s20 + $0x78] sm:$0xff] %v1261_v47  ;;  %v1183_v3 = vmax.f32 %v2213_v13, %v1110_v32  ;;  %v1664_v41 = vpop.f32.mrf.mxu0  ;;  %v1739_v48 = vpop.f32.mrf.mxu1 }
 0x13a   : > { %1289 = vst [vmem:[%s2250_s20 + $0x90] sm:$0xff] %v1264_v8  ;;  %v1263_v18 = vmax.f32 %v1238_v9, 0.0  ;;  %v1241_v19 = vadd.f32 %v2241_v28, %v1209_v40  ;;  %v1161_v49 = vmax.f32 %v2231_v22, %v1664_v41  ;;  %v1186_v33 = vmax.f32 %v2233_v23, %v1739_v48 }
 0x13b   : > { %v1208_v34 = vmax.f32 %v1158_v2, %v1183_v3  ;;  %v870_v35 = vpop.f32.mrf.mxu0  ;;  %v1120_v60 = vpop.f32.mrf.mxu1 }
 0x13c   : > { %1288 = vst [vmem:[%s2250_s20 + $0x88] sm:$0xff] %v1263_v18  ;;  %v1266_v36 = vmax.f32 %v1241_v19, 0.0  ;;  %v1211_v12 = vmax.f32 %v1161_v49, %v1186_v33  ;;  %v1160_v61 = vmax.f32 %v2219_v16, %v870_v35  ;;  %v1185_v13 = vmax.f32 %v2221_v17, %v1120_v60 }
 0x13d   : > { %v1240_v37 = vadd.f32 %v2241_v28, %v1208_v34  ;;  %v1667_v58 = vpop.f32.mrf.mxu0  ;;  %v1742_v59 = vpop.f32.mrf.mxu1 }
 0x13e   : > { %1291 = vst [vmem:[%s2250_s20 + $0xa0] sm:$0xff] %v1266_v36  ;;  %v1243_v22 = vadd.f32 %v2241_v28, %v1211_v12  ;;  %v1210_v23 = vmax.f32 %v1160_v61, %v1185_v13  ;;  %v1163_v6 = vmax.f32 %v2243_v29, %v1667_v58  ;;  %v1188_v7 = vmax.f32 %v2245_v30, %v1742_v59 }
 0x13f   : > { %v1265_v16 = vmax.f32 %v1240_v37, 0.0  ;;  %v880_v38 = vpop.f32.mrf.mxu0  ;;  %v1130_v17 = vpop.f32.mrf.mxu1 }
 0x140   : > { %v1268_v50 = vmax.f32 %v1243_v22, 0.0  ;;  %v1242_v51 = vadd.f32 %v2241_v28, %v1210_v23  ;;  %v1213_v21 = vmax.f32 %v1163_v6, %v1188_v7  ;;  %v1162_v39 = vmax.f32 %v2227_v20, %v880_v38 }
 0x141   : > { %1290 = vst [vmem:[%s2250_s20 + $0x98] sm:$0xff] %v1265_v16  ;;  %v1187_v1 = vmax.f32 %v2403_v0, %v1130_v17 }
 0x142   : > { %1293 = vst [vmem:[%s2250_s20 + $0xb0] sm:$0xff] %v1268_v50  ;;  %v1267_v29 = vmax.f32 %v1242_v51, 0.0  ;;  %v1245_v30 = vadd.f32 %v2241_v28, %v1213_v21 }
 0x143   : > { %v1212_v42 = vmax.f32 %v1162_v39, %v1187_v1 }
 0x144   : > { %1292 = vst [vmem:[%s2250_s20 + $0xa8] sm:$0xff] %v1267_v29  ;;  %v1270_v52 = vmax.f32 %v1245_v30, 0.0 }
 0x145   : > { %v1244_v43 = vadd.f32 %v2241_v28, %v1212_v42 }
 0x146   : > { %1295 = vst [vmem:[%s2250_s20 + $0xc0] sm:$0xff] %v1270_v52 }
 0x147   : > { %v1269_v20 = vmax.f32 %v1244_v43, 0.0 }
 0x149   : > { %1294 = vst [vmem:[%s2250_s20 + $0xb8] sm:$0xff] %v1269_v20 }
 0x14a   : > { %1808 = shalt.err (!%p1805_p3)
}
 0x14b   : > { %s1809_s6 = scalar_lea.hbm %s2349_s28, 3200  ;;  %s1813_s9 = scalar_lea.hbm %s2399_s3, 6400 }
 0x14c   : > { %p1810_p4 = scmp.ne.s32.totalorder %s2349_s28, %s1809_s6  ;;  %p1814_p9 = scmp.lt.s32.totalorder %s2349_s28, %s2399_s3 }
 0x14d   : > { %p1815_p10 = scmp.lt.s32.totalorder %s1813_s9, %s1809_s6 }
 0x14e   : > { %p1811_p7 = pnand %p1810_p4, %p1918_p5 }
 0x14f   : > { %p1816_p11 = por %p1815_p10, %p1814_p9 }
 0x150   : > { %p1812_p8 = pneg %p1811_p7 }
 0x152   : > { %p1817_p12 = pnand %p1816_p11, %p1812_p8 }
 0x154   : > { %1820 = shalt.err (!%p1817_p12)
}
 0x155   : > { %s1858_s17 = smov 128   ;;  %s1859_s19 = smov 8  }
 0x156   : > { %1754 = dma.vmem_to_hbm [thread:$0]  (%p1918_p5), %s2351_s25, 3200, %s2349_s28, %s2356_s16, %s1858_s17, %s1858_s17, %s1859_s19  }
 0x157 PF: > { %p1760_p13 = scmp.ge.s32.totalorder %s1855_s15, 2  ;;  %s1325_s20 = sand.u32 1, %s1843_s12  }
 0x158   : > { %s1326_s24 = scalar_lea.sflag [#allocation3], %s1325_s20 }
 0x159   : > { %p1757_p0 = pnand %p1760_p13, %p1922_p6 }
 0x15b   : > { %p1758_p1 = pneg %p1757_p0 }
 0x15d   : > { %1838 = dma.done.wait (%p1758_p1), %s1326_s24, 3200  }
 0x15e   : > { %1840 = vsyncadd (%p1758_p1), %s1326_s24, 4294964096  ;;  %p13_p2 = scmp.ge.s32.totalorder %s1905_s18, 4   ;;  %s2404_s12 = smov %s1847_s13 }
 0x15f   : > { %s2405_s13 = smov %s1851_s14  ;;  %s2406_s14 = smov %s1916_s21 }
 0x160   : > { %s2407_s15 = smov %s1905_s18  ;;  %15 = sbr.rel (!%p13_p2) target bundleno = 3 (0x3), region = 67 }
 0x165   :  { %1331 = vsyncpa [#allocation3], 1 }
 0x166   :  { %1333 = vsyncpa [#allocation3 + $0x1], 1 }

</bundles_post_ra>
